<compile_context>
chip_gen: v7x
topology: tpu7x:2x2x1
jax: 0.10.0
libtpu: 0.0.40
codegen_flags: <defaults>
</compile_context>

<pallas_src>
import functools

import numpy as np
import jax
import jax.numpy as jnp
from jax.experimental import pallas as pl
from jax.experimental.pallas import tpu as pltpu

LANES = 128


def _round_up(v, m):
    return ((v + m - 1) // m) * m


def nearest_resize_nhwc(x, h_out, w_out):
    # PyTorch F.interpolate(mode='nearest'): src = (dst * in) // out (integer).
    n, h_in, w_in, c = x.shape
    hi = jnp.minimum((jnp.arange(h_out) * h_in) // h_out, h_in - 1).astype(jnp.int32)
    wi = jnp.minimum((jnp.arange(w_out) * w_in) // w_out, w_in - 1).astype(jnp.int32)
    return x[:, hi][:, :, wi]


def _vmem_capacity_bytes():
    try:
        return int(pltpu.get_tpu_info().vmem_capacity_bytes)
    except Exception:
        return 64 * 1024 * 1024  # conservative (v7x-sized) fallback


# ----------------------------------------------------------------------------
# Kernel A: lane-dense per-channel batch-norm statistics (sum / sum-of-squares)
# ----------------------------------------------------------------------------
def _bn_stats_kernel(x_ref, sum_ref, sq_ref):
    @pl.when(pl.program_id(0) == 0)
    def _init():
        sum_ref[...] = jnp.zeros_like(sum_ref)
        sq_ref[...] = jnp.zeros_like(sq_ref)

    xb = x_ref[...]                                    # (tm, 128), fully lane-dense
    sum_ref[...] += jnp.sum(xb, axis=0, keepdims=True)
    sq_ref[...] += jnp.sum(xb * xb, axis=0, keepdims=True)


def bn_stats(x_nhwc, eps):
    n, h, w, c = x_nhwc.shape
    m = n * h * w
    total = m * c

    if LANES % c != 0:
        # TODO(synk): lane-dense per-channel fold needs 128 % C == 0; fall back
        # to plain-JAX statistics for exotic channel counts.
        mean = jnp.mean(x_nhwc, axis=(0, 1, 2))
        var = jnp.maximum(jnp.mean(jnp.square(x_nhwc), axis=(0, 1, 2)) - mean * mean, 0.0)
        return mean, jax.lax.rsqrt(var + eps)

    rows = -(-total // LANES)
    tm = 2048 if rows >= 2048 else _round_up(rows, 8)
    rows_p = _round_up(rows, tm)
    flat = x_nhwc.reshape(-1)
    pad = rows_p * LANES - total
    if pad:
        flat = jnp.pad(flat, (0, pad))                 # zeros do not affect the sums
    x2d = flat.reshape(rows_p, LANES)

    s128, q128 = pl.pallas_call(
        _bn_stats_kernel,
        out_shape=(jax.ShapeDtypeStruct((1, LANES), jnp.float32),
                   jax.ShapeDtypeStruct((1, LANES), jnp.float32)),
        grid=(rows_p // tm,),
        in_specs=[pl.BlockSpec((tm, LANES), lambda i: (i, 0))],
        out_specs=(pl.BlockSpec((1, LANES), lambda i: (0, 0)),
                   pl.BlockSpec((1, LANES), lambda i: (0, 0))),
        compiler_params=pltpu.CompilerParams(dimension_semantics=("arbitrary",)),
    )(x2d)

    # Fold the 128 lanes (NHWC is channel-minor, so lane % C == channel).
    s = jnp.sum(s128.reshape(LANES // c, c), axis=0)
    q = jnp.sum(q128.reshape(LANES // c, c), axis=0)
    mean = s / m
    var = jnp.maximum(q / m - mean * mean, 0.0)        # biased variance, clamped
    return mean, jax.lax.rsqrt(var + eps)


# ----------------------------------------------------------------------------
# Kernel B: fused (K-folded mlp_shared -> fused gamma/beta conv -> BN + SPADE)
# ----------------------------------------------------------------------------
def _spade_fused_kernel(x_ref, segm_ref, segh_ref, mean_ref, inv_ref,
                        w1_ref, b1_ref, w23_ref, opb_ref, b3_ref,
                        o_ref, actv_ref, *, th, w, wp, nh, c):
    t = pl.program_id(1)
    nt = pl.num_programs(1)
    th2 = th + 2
    c2 = 2 * c
    LPAD = 16  # aligned zero-column pad on the left of the activation slab

    # ---- mlp_shared: 3x3 conv + ReLU as ONE matmul with K = 9*label_nc.
    #      segm = this tile's th rows (pre-unfolded segmap), segh = 2 halo rows.
    sl = jnp.concatenate([segm_ref[0], segh_ref[0]], axis=0)        # (th2*w, K9) bf16
    a = jnp.dot(sl, w1_ref[...], preferred_element_type=jnp.float32)
    a = jnp.maximum(a + b1_ref[...], 0.0)                           # (th2*w, nh) f32

    # ---- Stage the activation as a bf16, W-zero-padded halo slab.  The
    #      top/bottom halo rows are zeroed only at the image boundary (they are
    #      real activation rows for interior tiles) via a mask, so the scratch
    #      is written with a single full-buffer store (no partial stores).
    a3 = a.reshape(th2, w, nh)
    row = jax.lax.broadcasted_iota(jnp.int32, (th2, 1, 1), 0)
    kill = ((row == 0) & (t == 0)) | ((row == th2 - 1) & (t == nt - 1))
    a3 = jnp.where(kill, 0.0, a3).astype(jnp.bfloat16)
    zl = jnp.zeros((th2, LPAD, nh), jnp.bfloat16)
    zr = jnp.zeros((th2, wp - LPAD - w, nh), jnp.bfloat16)
    actv_ref[...] = jnp.concatenate([zl, a3, zr], axis=1)           # (th2, wp, nh)

    # ---- Fused mlp_gamma + mlp_beta: 9 taps; each tap matmuls the SAME
    #      un-shifted slab and the (ky, kx) shift is applied to the narrow
    #      (2*norm_nc-lane) result before accumulation (no 128-lane patch
    #      copies, no HBM round-trip for gamma/beta).
    av = actv_ref[...].reshape(th2 * wp, nh)                        # bf16, wp % 16 == 0
    acc = jnp.zeros((th, w, c2), jnp.float32)
    for ky in range(3):
        for kx in range(3):
            full = jnp.dot(av, w23_ref[ky * 3 + kx],
                           preferred_element_type=jnp.float32)      # (th2*wp, 2C)
            full = full.reshape(th2, wp, c2)
            acc = acc + full[ky:ky + th, LPAD - 1 + kx:LPAD - 1 + kx + w, :]

    gamma = acc[..., :c]
    beta = acc[..., c:]

    # ---- Param-free batch-norm + SPADE modulation (conv biases pre-folded:
    #      opb = 1 + b_gamma, b3 = b_beta).
    xb = x_ref[0]                                                   # (th, w, C) f32
    norm = (xb - mean_ref[...]) * inv_ref[...]
    o_ref[0] = norm * (opb_ref[...] + gamma) + (b3_ref[...] + beta)


def spade_forward(x_nhwc, seg_nhwc, p, eps=1e-5):
    n, h, w, c = x_nhwc.shape
    label_nc = seg_nhwc.shape[-1]
    nh = p["w1"].shape[-1]                              # nhidden (128 in SPADE)
    k9 = 9 * label_nc
    k9p = _round_up(k9, 8)

    # 1) batch statistics of x (training-mode BN, affine=False)
    mean, inv = bn_stats(x_nhwc, eps)

    # 2) nearest-neighbour resize of the segmap to x's spatial size
    seg_r = nearest_resize_nhwc(seg_nhwc, h, w)

    # 3) 3x3 unfold of the (small, label_nc-channel) segmap in the wrapper:
    #    seg9[n, r, x, (ky*3+kx)*L + ci] = zero-padded seg at (r + ky, x + kx),
    #    row r corresponds to activation row (r - 1) (one halo row each side).
    seg_p1 = jnp.pad(seg_r, ((0, 0), (2, 2), (1, 1), (0, 0)))
    taps = [seg_p1[:, ky:ky + h + 2, kx:kx + w, :]
            for ky in range(3) for kx in range(3)]
    seg9 = jnp.concatenate(taps, axis=-1)               # (n, h+2, w, 9*L)
    if k9p != k9:
        seg9 = jnp.pad(seg9, ((0, 0), (0, 0), (0, 0), (0, k9p - k9)))
    seg9 = seg9.astype(jnp.bfloat16)

    # 4) VMEM-budget-aware H-tile selection (generation aware via get_tpu_info).
    wp = 16 + _round_up(w + 1, 16)                      # padded slab width (mult of 16)
    vmem_cap = _vmem_capacity_bytes()
    vmem_limit = min(vmem_cap * 3 // 4, 112 * 1024 * 1024)
    budget = vmem_limit // 2

    def _est(d):
        d2 = d + 2
        est = 2 * 2 * d * w * LANES * 4                 # x + out blocks (lane-padded), 2x buffered
        est += 2 * (d * w + 2 * w) * LANES * 2          # seg main + halo blocks, bf16, 2x buffered
        est += d2 * wp * nh * 2                         # activation scratch (bf16)
        est += d2 * wp * nh * 2                         # staged slab value
        est += d2 * w * nh * 6                          # conv1 f32 result + bf16 copy
        est += 2 * d2 * wp * LANES * 4                  # per-tap conv2 result (lane-padded)
        est += d * w * LANES * 4                        # gamma/beta accumulator (lane-padded)
        return est

    if (2 * w) % 8 == 0:
        divs = [d for d in range(1, h + 1) if h % d == 0 and (d * w) % 8 == 0]
    else:
        divs = [h]
    th = None
    for d in sorted(divs, reverse=True):
        if _est(d) <= budget:
            th = d
            break
    if th is None:
        th = min(divs)
    num_t = h // th

    # 5) per-tile segmap inputs (main rows + 2 halo rows), fed by the normal
    #    BlockSpec pipeline (prefetch overlapped, no in-kernel DMA).
    seg_main = seg9[:, :h].reshape(n, h * w, k9p)
    hidx = ((jnp.arange(num_t) + 1) * th)[:, None] + jnp.arange(2)[None, :]
    seg_halo = seg9[:, hidx.reshape(-1)].reshape(n, num_t * 2 * w, k9p)

    # 6) weights / per-channel vectors
    w1r = p["w1"].reshape(k9, nh)
    if k9p != k9:
        w1r = jnp.pad(w1r, ((0, k9p - k9), (0, 0)))
    w1r = w1r.astype(jnp.bfloat16)
    b1r = p["b1"].reshape(1, nh).astype(jnp.float32)
    w23r = jnp.concatenate([p["w2"], p["w3"]], axis=-1).reshape(9, nh, 2 * c)
    w23r = w23r.astype(jnp.bfloat16)
    opb = (1.0 + p["b2"]).reshape(1, 1, c).astype(jnp.float32)
    b3r = p["b3"].reshape(1, 1, c).astype(jnp.float32)
    meanr = mean.reshape(1, 1, c).astype(jnp.float32)
    invr = inv.reshape(1, 1, c).astype(jnp.float32)

    kern = functools.partial(_spade_fused_kernel, th=th, w=w, wp=wp, nh=nh, c=c)
    flops = 2 * n * num_t * (th + 2) * w * nh * (k9p + 9 * 2 * c)
    bytes_accessed = (4 * 2 * n * h * w * c
                      + 2 * (n * (h + 2) * w * k9p + n * num_t * 2 * w * k9p)
                      + 2 * (k9p * nh + 9 * nh * 2 * c) + 4 * (nh + 6 * c))

    out = pl.pallas_call(
        kern,
        out_shape=jax.ShapeDtypeStruct((n, h, w, c), jnp.float32),
        grid=(n, num_t),
        in_specs=[
            pl.BlockSpec((1, th, w, c), lambda b, t: (b, t, 0, 0)),     # x
            pl.BlockSpec((1, th * w, k9p), lambda b, t: (b, t, 0)),     # seg9 main rows
            pl.BlockSpec((1, 2 * w, k9p), lambda b, t: (b, t, 0)),      # seg9 halo rows
            pl.BlockSpec((1, 1, c), lambda b, t: (0, 0, 0)),            # mean
            pl.BlockSpec((1, 1, c), lambda b, t: (0, 0, 0)),            # inv_std
            pl.BlockSpec((k9p, nh), lambda b, t: (0, 0)),               # w1 (K-folded)
            pl.BlockSpec((1, nh), lambda b, t: (0, 0)),                 # b1
            pl.BlockSpec((9, nh, 2 * c), lambda b, t: (0, 0, 0)),       # w_gamma || w_beta
            pl.BlockSpec((1, 1, c), lambda b, t: (0, 0, 0)),            # 1 + b_gamma
            pl.BlockSpec((1, 1, c), lambda b, t: (0, 0, 0)),            # b_beta
        ],
        out_specs=pl.BlockSpec((1, th, w, c), lambda b, t: (b, t, 0, 0)),
        scratch_shapes=[pltpu.VMEM((th + 2, wp, nh), jnp.bfloat16)],
        compiler_params=pltpu.CompilerParams(
            dimension_semantics=("parallel", "parallel"),
            vmem_limit_bytes=int(vmem_limit),
        ),
        cost_estimate=pl.CostEstimate(flops=int(flops), transcendentals=0,
                                      bytes_accessed=int(bytes_accessed)),
    )(x_nhwc, seg_main, seg_halo, meanr, invr, w1r, b1r, w23r, opb, b3r)
    return out


# ----------------------------------------------------------------------------
# Pure-JAX reference (for correctness check)
# ----------------------------------------------------------------------------
def spade_reference(x_nhwc, seg_nhwc, p, eps=1e-5):
    mean = jnp.mean(x_nhwc, axis=(0, 1, 2), keepdims=True)
    var = jnp.mean((x_nhwc - mean) ** 2, axis=(0, 1, 2), keepdims=True)
    normalized = (x_nhwc - mean) * jax.lax.rsqrt(var + eps)

    h, w = x_nhwc.shape[1], x_nhwc.shape[2]
    seg_r = nearest_resize_nhwc(seg_nhwc, h, w)

    def conv(x, wt, b):
        y = jax.lax.conv_general_dilated(
            x, wt, window_strides=(1, 1), padding="SAME",
            dimension_numbers=("NHWC", "HWIO", "NHWC"),
            precision=jax.lax.Precision.HIGHEST)
        return y + b

    actv = jax.nn.relu(conv(seg_r, p["w1"], p["b1"]))
    gamma = conv(actv, p["w2"], p["b2"])
    beta = conv(actv, p["w3"], p["b3"])
    return normalized * (1.0 + gamma) + beta


# ----------------------------------------------------------------------------
if __name__ == "__main__":
    key = jax.random.PRNGKey(0)
    ks = jax.random.split(key, 8)

    N, norm_nc, H, W = 2, 4, 16, 16       # x: (N, norm_nc, H, W), PyTorch NCHW
    label_nc, Hs, Ws = 3, 8, 8            # segmap at lower res -> nearest upsample
    nhidden = 128                         # fixed by SPADE.__init__

    x_nchw = jax.random.normal(ks[0], (N, norm_nc, H, W), jnp.float32)
    seg_nchw = jax.random.normal(ks[1], (N, label_nc, Hs, Ws), jnp.float32)

    # Deterministic synthetic parameters (HWIO conv weights).
    params = {
        "w1": 0.05 * jax.random.normal(ks[2], (3, 3, label_nc, nhidden), jnp.float32),
        "b1": 0.05 * jax.random.normal(ks[3], (nhidden,), jnp.float32),
        "w2": 0.05 * jax.random.normal(ks[4], (3, 3, nhidden, norm_nc), jnp.float32),
        "b2": 0.05 * jax.random.normal(ks[5], (norm_nc,), jnp.float32),
        "w3": 0.05 * jax.random.normal(ks[6], (3, 3, nhidden, norm_nc), jnp.float32),
        "b3": 0.05 * jax.random.normal(ks[7], (norm_nc,), jnp.float32),
    }

    # NCHW -> NHWC for the kernels.
    x_nhwc = jnp.transpose(x_nchw, (0, 2, 3, 1))
    seg_nhwc = jnp.transpose(seg_nchw, (0, 2, 3, 1))

    out = spade_forward(x_nhwc, seg_nhwc, params)
    out = jax.block_until_ready(out)

    ref = spade_reference(x_nhwc, seg_nhwc, params)
    err = float(np.max(np.abs(np.asarray(out) - np.asarray(ref))))
    assert np.allclose(np.asarray(out), np.asarray(ref), atol=2e-2, rtol=2e-2), err

    print("KERNEL_OK")
</pallas_src>

<mosaic_0001>
module attributes {stable_mosaic.version = 11 : i64} {
  func.func @_bn_stats_kernel(%arg0: i32, %arg1: memref<16x128xf32, #tpu.memory_space<vmem>>, %arg2: memref<1x128xf32, #tpu.memory_space<vmem>>, %arg3: memref<1x128xf32, #tpu.memory_space<vmem>>) attributes {dimension_semantics = [#tpu.dimension_semantics<arbitrary>], iteration_bounds = array<i64: 1>, scalar_prefetch = 0 : i64, scratch_operands = 0 : i64, tpu.core_type = #tpu.core_type<tc>, window_params = [{transform_indices = @transform_0, window_bounds = array<i64: 16, 128>}, {pipeline_mode = #tpu.pipeline_mode<synchronous>, transform_indices = @transform_1, window_bounds = array<i64: 1, 128>}, {pipeline_mode = #tpu.pipeline_mode<synchronous>, transform_indices = @transform_2, window_bounds = array<i64: 1, 128>}]} {
    %c0_i32 = arith.constant 0 : i32
    %0 = arith.cmpi eq, %arg0, %c0_i32 : i32
    %1 = arith.extui %0 : i1 to i32
    %c0_i32_0 = arith.constant 0 : i32
    %2 = arith.cmpi ne, %1, %c0_i32_0 : i32
    scf.if %2 {
      %cst_11 = arith.constant 0.000000e+00 : f32
      %15 = vector.broadcast %cst_11 : f32 to vector<1x128xf32>
      %c0_12 = arith.constant 0 : index
      %c0_13 = arith.constant 0 : index
      %16 = vector.load %arg2[%c0_12, %c0_13] : memref<1x128xf32, #tpu.memory_space<vmem>>, vector<1x128xf32>
      tpu.vector_store %arg2[%c0_12, %c0_13], %15 {strides = array<i32>} : memref<1x128xf32, #tpu.memory_space<vmem>>, vector<1x128xf32>,
      %cst_14 = arith.constant 0.000000e+00 : f32
      %17 = vector.broadcast %cst_14 : f32 to vector<1x128xf32>
      %c0_15 = arith.constant 0 : index
      %c0_16 = arith.constant 0 : index
      %18 = vector.load %arg3[%c0_15, %c0_16] : memref<1x128xf32, #tpu.memory_space<vmem>>, vector<1x128xf32>
      tpu.vector_store %arg3[%c0_15, %c0_16], %17 {strides = array<i32>} : memref<1x128xf32, #tpu.memory_space<vmem>>, vector<1x128xf32>,
    } else {
    }
    %c0 = arith.constant 0 : index
    %c0_1 = arith.constant 0 : index
    %3 = vector.load %arg1[%c0, %c0_1] : memref<16x128xf32, #tpu.memory_space<vmem>>, vector<16x128xf32>
    %c0_2 = arith.constant 0 : index
    %c0_3 = arith.constant 0 : index
    %4 = vector.load %arg2[%c0_2, %c0_3] : memref<1x128xf32, #tpu.memory_space<vmem>>, vector<1x128xf32>
    %cst = arith.constant dense<0.000000e+00> : vector<128xf32>
    %5 = vector.multi_reduction <add>, %3, %cst [0] : vector<16x128xf32> to vector<128xf32>
    %6 = vector.shape_cast %5 : vector<128xf32> to vector<1x128xf32>
    %7 = arith.addf %4, %6 : vector<1x128xf32>
    %c0_4 = arith.constant 0 : index
    %c0_5 = arith.constant 0 : index
    %8 = vector.load %arg2[%c0_4, %c0_5] : memref<1x128xf32, #tpu.memory_space<vmem>>, vector<1x128xf32>
    tpu.vector_store %arg2[%c0_4, %c0_5], %7 {strides = array<i32>} : memref<1x128xf32, #tpu.memory_space<vmem>>, vector<1x128xf32>,
    %c0_6 = arith.constant 0 : index
    %c0_7 = arith.constant 0 : index
    %9 = vector.load %arg3[%c0_6, %c0_7] : memref<1x128xf32, #tpu.memory_space<vmem>>, vector<1x128xf32>
    %10 = arith.mulf %3, %3 : vector<16x128xf32>
    %cst_8 = arith.constant dense<0.000000e+00> : vector<128xf32>
    %11 = vector.multi_reduction <add>, %10, %cst_8 [0] : vector<16x128xf32> to vector<128xf32>
    %12 = vector.shape_cast %11 : vector<128xf32> to vector<1x128xf32>
    %13 = arith.addf %9, %12 : vector<1x128xf32>
    %c0_9 = arith.constant 0 : index
    %c0_10 = arith.constant 0 : index
    %14 = vector.load %arg3[%c0_9, %c0_10] : memref<1x128xf32, #tpu.memory_space<vmem>>, vector<1x128xf32>
    tpu.vector_store %arg3[%c0_9, %c0_10], %13 {strides = array<i32>} : memref<1x128xf32, #tpu.memory_space<vmem>>, vector<1x128xf32>,
    return
  }
  func.func @transform_0(%arg0: i32) -> (i32, i32) {
    %c0_i32 = arith.constant 0 : i32
    %c0_i32_0 = arith.constant 0 : i32
    return %arg0, %c0_i32 : i32, i32
  }
  func.func @transform_1(%arg0: i32) -> (i32, i32) {
    %c0_i32 = arith.constant 0 : i32
    %c0_i32_0 = arith.constant 0 : i32
    %c0_i32_1 = arith.constant 0 : i32
    return %c0_i32, %c0_i32_0 : i32, i32
  }
  func.func @transform_2(%arg0: i32) -> (i32, i32) {
    %c0_i32 = arith.constant 0 : i32
    %c0_i32_0 = arith.constant 0 : i32
    %c0_i32_1 = arith.constant 0 : i32
    return %c0_i32, %c0_i32_0 : i32, i32
  }
}

</mosaic_0001>

<bundles_post_ra>
// kernel: tpu_custom_call.1
= control target key start
LH: loop header
LB: loop body
LE: loop exit
PB: predicated region body
PF: predicated region fallthrough
CT: control target
= control target key end

     0   :  { %8 = vsyncpa [#allocation3], 0  ;;  %s228_s0 = inlined_call_operand.hbm [shape: f32[16,128], index: 0, kind: input, shape index: {}]   ;;  %s229_s1 = inlined_call_operand.hbm [shape: f32[1,128], index: 1, kind: output, shape index: {0}]   ;;  %s230_s2 = inlined_call_operand.hbm [shape: f32[1,128], index: 2, kind: output, shape index: {1}]  }
   0x1   :  { %9 = vsyncpa [#allocation4], 0 }
   0x2   :  { %10 = vsyncpa [#allocation7], 0  ;;  %s163_s9 = smov [#allocation2]   ;;  %s91_s13 = scalar_lea.hbm %s228_s0, 256 }
   0x3   :  { %s16_s10 = sshll.u32 %s163_s9, 4  ;;  %p92_p0 = scmp.ne.s32.totalorder %s228_s0, %s91_s13  ;;  %s17_s10 = int_to_ptr.vmem [resolvable:$true] %s16_s10 }
   0x4   :  { %p95_p1 = scmp.lt.u32.totalorder %s91_s13, %s228_s0 }
   0x6   :  { %p97_p2 = pnand %p95_p1, %p92_p0 }
   0x8   :  { %100 = shalt.err (!%p97_p2)
}
   0x9   :  { %s101_s18 = scalar_lea.vmem %s17_s10, 256  ;;  %p106_p4 = scmp.lt.s32.totalorder %s17_s10, %s17_s10 }
   0xa   :  { %p102_p3 = scmp.ne.s32.totalorder %s17_s10, %s101_s18  ;;  %p107_p5 = scmp.lt.s32.totalorder %s101_s18, %s101_s18 }
   0xc   :  { %p108_p6 = por %p107_p5, %p106_p4 }
   0xe   :  { %p109_p7 = pnand %p108_p6, %p102_p3 }
  0x10   :  { %112 = shalt.err (!%p109_p7)
}
  0x11   :  { %s164_s19 = smov 128   ;;  %s165_s20 = smov 8  }
  0x12   :  { %22 = dma.hbm_to_vmem [thread:$0]  %s228_s0, 256, %s17_s10, [#allocation3], %s164_s19, %s164_s19, %s165_s20  }
  0x13   :  { %157 = dma.done.wait [#allocation3], 256  }
  0x14   :  { %158 = vsyncadd [#allocation3], 4294967040  ;;  %v166_v0 = vmov 0.0   ;;  %v32_v1 = vld [vmem:[#allocation2] sm:$0xff]  ;;  %v33_v2 = vld [vmem:[#allocation2 + $0x8] sm:$0xff]  ;;  %s167_s0 = smov [#allocation5]  }
  0x15   :  { %30 = vst [vmem:[#allocation5] sm:$0x1] %v166_v0  ;;  %31 = vst [vmem:[#allocation6] sm:$0x1] %v166_v0  ;;  %v35_v3 = vadd.f32 %v33_v2, %v32_v1  ;;  %v45_v4 = vmul.f32 %v32_v1, %v32_v1  ;;  %v46_v5 = vmul.f32 %v33_v2, %v33_v2  ;;  %s62_s23 = sshll.u32 %s167_s0, 4  ;;  %s168_s24 = smov [#allocation6]   ;;  %s63_s23 = int_to_ptr.vmem [resolvable:$true] %s62_s23 }
  0x16   :  { %s72_s25 = sshll.u32 %s168_s24, 4  ;;  %s113_s26 = scalar_lea.vmem %s63_s23, 16  ;;  %s196_s25 = int_to_ptr.vmem [resolvable:$true] %s72_s25 }
  0x17   :  { %v36_v6 = vrot.slane %v35_v3, 4  ;;  %v47_v7 = vadd.f32 %v46_v5, %v45_v4  ;;  %p114_p8 = scmp.ne.s32.totalorder %s63_s23, %s113_s26  ;;  %s117_s27 = scalar_lea.vmem %s63_s23, 32 }
  0x18   :  { %p118_p9 = scmp.lt.s32.totalorder %s63_s23, %s63_s23  ;;  %p119_p10 = scmp.lt.s32.totalorder %s117_s27, %s113_s26 }
  0x19   :  { %v37_v8 = vadd.f32 %v36_v6, %v35_v3  ;;  %v48_v9 = vrot.slane %v47_v7, 4 }
  0x1a   :  { %p120_p11 = por %p119_p10, %p118_p9 }
  0x1b   :  { %v38_v10 = vrot.slane %v37_v8, 2  ;;  %v49_v11 = vadd.f32 %v48_v9, %v47_v7 }
  0x1c   :  { %v34_v16 = vld [vmem:[#allocation5] sm:$0x1]  ;;  %v44_v19 = vld [vmem:[#allocation6] sm:$0x1]  ;;  %p121_p12 = pnand %p120_p11, %p114_p8 }
  0x1d   :  { %v39_v12 = vadd.f32 %v38_v10, %v37_v8  ;;  %v50_v13 = vrot.slane %v49_v11, 2 }
  0x1f   :  { %v40_v14 = vrot.slane %v39_v12, 1  ;;  %v51_v15 = vadd.f32 %v50_v13, %v49_v11 }
  0x21   :  { %v41_v17 = vadd.f32 %v40_v14, %v39_v12  ;;  %v52_v18 = vrot.slane %v51_v15, 1 }
  0x23   :  { %v42_v20 = vadd.f32 %v41_v17, %v34_v16  ;;  %v53_v21 = vadd.f32 %v52_v18, %v51_v15 }
  0x25   :  { %43 = vst [vmem:[#allocation5] sm:$0x1] %v42_v20  ;;  %v54_v22 = vadd.f32 %v53_v21, %v44_v19 }
  0x26   :  { %124 = shalt.err (!%p121_p12)
}
  0x27   :  { %s125_s30 = scalar_lea.hbm %s229_s1, 16 }
  0x28   :  { %p126_p13 = scmp.ne.s32.totalorder %s229_s1, %s125_s30  ;;  %p129_p0 = scmp.lt.u32.totalorder %s125_s30, %s229_s1 }
  0x2a   :  { %p131_p1 = pnand %p129_p0, %p126_p13 }
  0x2c   :  { %134 = shalt.err (!%p131_p1)
}
  0x2d   :  { %65 = dma.vmem_to_hbm [thread:$0]  %s63_s23, 16, %s229_s1, [#allocation4]   ;;  %55 = vst [vmem:[#allocation6] sm:$0x1] %v54_v22 }
  0x2e   :  { %s135_s9 = scalar_lea.vmem %s196_s25, 16  ;;  %s139_s10 = scalar_lea.vmem %s196_s25, 32 }
  0x2f   :  { %p136_p2 = scmp.ne.s32.totalorder %s196_s25, %s135_s9  ;;  %p140_p3 = scmp.lt.s32.totalorder %s196_s25, %s196_s25 }
  0x30   :  { %p141_p4 = scmp.lt.s32.totalorder %s139_s10, %s135_s9 }
  0x32   :  { %p142_p5 = por %p141_p4, %p140_p3 }
  0x34   :  { %p143_p6 = pnand %p142_p5, %p136_p2 }
  0x36   :  { %146 = shalt.err (!%p143_p6)
}
  0x37   :  { %s147_s13 = scalar_lea.hbm %s230_s2, 16 }
  0x38   :  { %p148_p7 = scmp.ne.s32.totalorder %s230_s2, %s147_s13  ;;  %p151_p8 = scmp.lt.u32.totalorder %s147_s13, %s230_s2 }
  0x3a   :  { %p153_p9 = pnand %p151_p8, %p148_p7 }
  0x3c   :  { %156 = shalt.err (!%p153_p9)
}
  0x3d   :  { %75 = dma.vmem_to_hbm [thread:$0]  %s196_s25, 16, %s230_s2, [#allocation7]  }
  0x3e   :  { %159 = dma.done.wait [#allocation4], 16  }
  0x3f   :  { %160 = vsyncadd [#allocation4], 4294967280 }
  0x40   :  { %161 = dma.done.wait [#allocation7], 16  }
  0x41   :  { %162 = vsyncadd [#allocation7], 4294967280 }
  0x42   :  { %82 = vsyncpa [#allocation3], 1 }
  0x43   :  { %83 = vsyncpa [#allocation4], 1 }
  0x44   :  { %84 = vsyncpa [#allocation7], 1 }

</bundles_post_ra>
